<compile_context>
chip_gen: v7x
topology: tpu7x:2x2x1
jax: 0.10.0
libtpu: 0.0.40
codegen_flags: <defaults>
</compile_context>

<pallas_src>
import functools

import jax
import jax.numpy as jnp
from jax.experimental import pallas as pl
from jax.experimental.pallas import tpu as pltpu


HIDDEN_PAD = 256   # 200 -> 256 (multiple of 128 / 256-wide MXU friendly)
OUT_PAD = 128      # 10  -> 128 (lane-dense output slab)
IN_FEATURES = 784


def _round_up(x, m):
    return ((x + m - 1) // m) * m


def mnist_2nn_kernel(x_ref, w1_ref, b1_ref, w2_ref, b2_ref, w3_ref, b3_ref,
                     o_ref):
    # Layer 1: (TB,784)bf16 @ (784,256)bf16 -> f32, +bias, ReLU (f32 epilogue)
    h1 = jnp.dot(x_ref[...], w1_ref[...], preferred_element_type=jnp.float32)
    h1 = jnp.maximum(h1 + b1_ref[...], 0.0)
    # Layer 2: (TB,256)bf16 @ (256,256)bf16 -> f32, +bias, ReLU
    h2 = jnp.dot(h1.astype(jnp.bfloat16), w2_ref[...],
                 preferred_element_type=jnp.float32)
    h2 = jnp.maximum(h2 + b2_ref[...], 0.0)
    # Layer 3: (TB,256)bf16 @ (256,128)bf16 -> f32, +bias (padded cols are 0)
    h3 = jnp.dot(h2.astype(jnp.bfloat16), w3_ref[...],
                 preferred_element_type=jnp.float32)
    o_ref[...] = (h3 + b3_ref[...]).astype(o_ref.dtype)


@functools.partial(jax.jit, static_argnames=("tb",))
def mnist_2nn_forward(x, params, *, tb=256):
    """x: (B, 784) float32. params: w1,b1,w2,b2,w3,b3 in PyTorch-like layout
    (weights pre-transposed to (in, out), biases (1, out))."""
    B = x.shape[0]
    w1, b1 = params["w1"], params["b1"]
    w2, b2 = params["w2"], params["b2"]
    w3, b3 = params["w3"], params["b3"]

    # Batch tile: multiple of 16 (bf16 sublane packing); keep it modest so the
    # double-buffered x tiles + activations fit VMEM on all generations
    # (v7x has only 64 MiB physical VMEM split across 2 TCs).
    tb = min(tb, _round_up(B, 16))
    tb = _round_up(tb, 16)
    b_pad = _round_up(B, tb)
    grid = (b_pad // tb,)

    # Zero-pad + cast. Padded hidden units / logit lanes stay exactly zero
    # through ReLU, so math is unchanged; the wrapper slices back to 10 cols.
    xp = jnp.zeros((b_pad, IN_FEATURES), jnp.bfloat16).at[:B].set(
        x.astype(jnp.bfloat16))
    w1p = jnp.zeros((IN_FEATURES, HIDDEN_PAD), jnp.bfloat16).at[:, :200].set(
        w1.astype(jnp.bfloat16))
    b1p = jnp.zeros((1, HIDDEN_PAD), jnp.float32).at[:, :200].set(b1)
    w2p = jnp.zeros((HIDDEN_PAD, HIDDEN_PAD), jnp.bfloat16).at[:200, :200].set(
        w2.astype(jnp.bfloat16))
    b2p = jnp.zeros((1, HIDDEN_PAD), jnp.float32).at[:, :200].set(b2)
    w3p = jnp.zeros((HIDDEN_PAD, OUT_PAD), jnp.bfloat16).at[:200, :10].set(
        w3.astype(jnp.bfloat16))
    b3p = jnp.zeros((1, OUT_PAD), jnp.float32).at[:, :10].set(b3)

    # Weights/biases: constant block index -> DMA'd once, VMEM-resident.
    resident = lambda shape: pl.BlockSpec(shape, lambda i: (0, 0))

    flops = 2 * b_pad * (IN_FEATURES * HIDDEN_PAD
                         + HIDDEN_PAD * HIDDEN_PAD
                         + HIDDEN_PAD * OUT_PAD)
    bytes_accessed = (xp.size * 2
                      + (w1p.size + w2p.size + w3p.size) * 2
                      + (b1p.size + b2p.size + b3p.size) * 4
                      + b_pad * OUT_PAD * 4)

    out = pl.pallas_call(
        mnist_2nn_kernel,
        out_shape=jax.ShapeDtypeStruct((b_pad, OUT_PAD), jnp.float32),
        grid_spec=pltpu.PrefetchScalarGridSpec(
            num_scalar_prefetch=0,
            grid=grid,
            in_specs=[
                pl.BlockSpec((tb, IN_FEATURES), lambda i: (i, 0)),  # streamed x
                resident((IN_FEATURES, HIDDEN_PAD)),
                resident((1, HIDDEN_PAD)),
                resident((HIDDEN_PAD, HIDDEN_PAD)),
                resident((1, HIDDEN_PAD)),
                resident((HIDDEN_PAD, OUT_PAD)),
                resident((1, OUT_PAD)),
            ],
            out_specs=pl.BlockSpec((tb, OUT_PAD), lambda i: (i, 0)),
        ),
        compiler_params=pltpu.CompilerParams(
            dimension_semantics=("parallel",),   # megacore split on v7x
            vmem_limit_bytes=64 * 1024 * 1024,
        ),
        cost_estimate=pl.CostEstimate(
            flops=flops, transcendentals=0, bytes_accessed=bytes_accessed),
    )(xp, w1p, b1p, w2p, b2p, w3p, b3p)

    return out[:B, :10]


def init_params(key):
    """Init mimicking nn.Linear's U(-1/sqrt(fan_in), +1/sqrt(fan_in)).
    Weights stored as (in, out) (transposed vs PyTorch), biases as (1, out)."""
    def linear(key, fan_in, fan_out):
        kw, kb = jax.random.split(key)
        bound = 1.0 / jnp.sqrt(fan_in)
        w = jax.random.uniform(kw, (fan_in, fan_out), jnp.float32,
                               minval=-bound, maxval=bound)
        b = jax.random.uniform(kb, (1, fan_out), jnp.float32,
                               minval=-bound, maxval=bound)
        return w, b

    k1, k2, k3 = jax.random.split(key, 3)
    w1, b1 = linear(k1, 784, 200)
    w2, b2 = linear(k2, 200, 200)
    w3, b3 = linear(k3, 200, 10)
    return {"w1": w1, "b1": b1, "w2": w2, "b2": b2, "w3": w3, "b3": b3}


def reference_forward(x, p):
    h = jnp.maximum(x @ p["w1"] + p["b1"], 0.0)
    h = jnp.maximum(h @ p["w2"] + p["b2"], 0.0)
    return h @ p["w3"] + p["b3"]


if __name__ == "__main__":
    key = jax.random.PRNGKey(0)
    kx, kp = jax.random.split(key)

    B = 2
    x = jax.random.normal(kx, (B, 784), jnp.float32)
    params = init_params(kp)

    out = mnist_2nn_forward(x, params)
    out = jax.block_until_ready(out)

    ref = reference_forward(x, params)
    assert out.shape == (B, 10), out.shape
    # bf16 matmul inputs with f32 accumulation -> loose tolerance vs f32 ref.
    assert jnp.allclose(out, ref, atol=5e-2, rtol=5e-2), "mismatch vs reference"

    print("KERNEL_OK")
</pallas_src>

<mosaic_0001>
module attributes {stable_mosaic.version = 11 : i64} {
  func.func @mnist_2nn_kernel(%arg0: i32, %arg1: memref<16x784xbf16, #tpu.memory_space<vmem>>, %arg2: memref<784x256xbf16, #tpu.memory_space<vmem>>, %arg3: memref<1x256xf32, #tpu.memory_space<vmem>>, %arg4: memref<256x256xbf16, #tpu.memory_space<vmem>>, %arg5: memref<1x256xf32, #tpu.memory_space<vmem>>, %arg6: memref<256x128xbf16, #tpu.memory_space<vmem>>, %arg7: memref<1x128xf32, #tpu.memory_space<vmem>>, %arg8: memref<16x128xf32, #tpu.memory_space<vmem>>) attributes {dimension_semantics = [#tpu.dimension_semantics<parallel>], iteration_bounds = array<i64: 1>, scalar_prefetch = 0 : i64, scratch_operands = 0 : i64, tpu.core_type = #tpu.core_type<tc>, window_params = [{transform_indices = @transform_0, window_bounds = array<i64: 16, 784>}, {pipeline_mode = #tpu.pipeline_mode<synchronous>, transform_indices = @transform_1, window_bounds = array<i64: 784, 256>}, {pipeline_mode = #tpu.pipeline_mode<synchronous>, transform_indices = @transform_2, window_bounds = array<i64: 1, 256>}, {pipeline_mode = #tpu.pipeline_mode<synchronous>, transform_indices = @transform_3, window_bounds = array<i64: 256, 256>}, {pipeline_mode = #tpu.pipeline_mode<synchronous>, transform_indices = @transform_4, window_bounds = array<i64: 1, 256>}, {pipeline_mode = #tpu.pipeline_mode<synchronous>, transform_indices = @transform_5, window_bounds = array<i64: 256, 128>}, {pipeline_mode = #tpu.pipeline_mode<synchronous>, transform_indices = @transform_6, window_bounds = array<i64: 1, 128>}, {transform_indices = @transform_7, window_bounds = array<i64: 16, 128>}]} {
    %c0 = arith.constant 0 : index
    %c0_0 = arith.constant 0 : index
    %0 = vector.load %arg1[%c0, %c0_0] : memref<16x784xbf16, #tpu.memory_space<vmem>>, vector<16x784xbf16>
    %c0_1 = arith.constant 0 : index
    %c0_2 = arith.constant 0 : index
    %1 = vector.load %arg2[%c0_1, %c0_2] : memref<784x256xbf16, #tpu.memory_space<vmem>>, vector<784x256xbf16>
    %cst = arith.constant dense<0.000000e+00> : vector<16x256xf32>
    %2 = tpu.matmul %0, %1, %cst {dimension_numbers = #tpu.dot_dimension_numbers<[1], [0], [0], [1], [0, 0, 1, 1], [], []>} : vector<16x784xbf16>, vector<784x256xbf16>, vector<16x256xf32> -> vector<16x256xf32>
    %c0_3 = arith.constant 0 : index
    %c0_4 = arith.constant 0 : index
    %3 = vector.load %arg3[%c0_3, %c0_4] : memref<1x256xf32, #tpu.memory_space<vmem>>, vector<1x256xf32>
    %4 = vector.broadcast %3 : vector<1x256xf32> to vector<16x256xf32>
    %5 = arith.addf %2, %4 : vector<16x256xf32>
    %cst_5 = arith.constant 0.000000e+00 : f32
    %6 = vector.broadcast %cst_5 : f32 to vector<16x256xf32>
    %7 = arith.maximumf %5, %6 : vector<16x256xf32>
    %8 = arith.truncf %7 : vector<16x256xf32> to vector<16x256xbf16>
    %c0_6 = arith.constant 0 : index
    %c0_7 = arith.constant 0 : index
    %9 = vector.load %arg4[%c0_6, %c0_7] : memref<256x256xbf16, #tpu.memory_space<vmem>>, vector<256x256xbf16>
    %cst_8 = arith.constant dense<0.000000e+00> : vector<16x256xf32>
    %10 = tpu.matmul %8, %9, %cst_8 {dimension_numbers = #tpu.dot_dimension_numbers<[1], [0], [0], [1], [0, 0, 1, 1], [], []>} : vector<16x256xbf16>, vector<256x256xbf16>, vector<16x256xf32> -> vector<16x256xf32>
    %c0_9 = arith.constant 0 : index
    %c0_10 = arith.constant 0 : index
    %11 = vector.load %arg5[%c0_9, %c0_10] : memref<1x256xf32, #tpu.memory_space<vmem>>, vector<1x256xf32>
    %12 = vector.broadcast %11 : vector<1x256xf32> to vector<16x256xf32>
    %13 = arith.addf %10, %12 : vector<16x256xf32>
    %cst_11 = arith.constant 0.000000e+00 : f32
    %14 = vector.broadcast %cst_11 : f32 to vector<16x256xf32>
    %15 = arith.maximumf %13, %14 : vector<16x256xf32>
    %16 = arith.truncf %15 : vector<16x256xf32> to vector<16x256xbf16>
    %c0_12 = arith.constant 0 : index
    %c0_13 = arith.constant 0 : index
    %17 = vector.load %arg6[%c0_12, %c0_13] : memref<256x128xbf16, #tpu.memory_space<vmem>>, vector<256x128xbf16>
    %cst_14 = arith.constant dense<0.000000e+00> : vector<16x128xf32>
    %18 = tpu.matmul %16, %17, %cst_14 {dimension_numbers = #tpu.dot_dimension_numbers<[1], [0], [0], [1], [0, 0, 1, 1], [], []>} : vector<16x256xbf16>, vector<256x128xbf16>, vector<16x128xf32> -> vector<16x128xf32>
    %c0_15 = arith.constant 0 : index
    %c0_16 = arith.constant 0 : index
    %19 = vector.load %arg7[%c0_15, %c0_16] : memref<1x128xf32, #tpu.memory_space<vmem>>, vector<1x128xf32>
    %20 = vector.broadcast %19 : vector<1x128xf32> to vector<16x128xf32>
    %21 = arith.addf %18, %20 : vector<16x128xf32>
    %c0_17 = arith.constant 0 : index
    %c0_18 = arith.constant 0 : index
    %22 = vector.load %arg8[%c0_17, %c0_18] : memref<16x128xf32, #tpu.memory_space<vmem>>, vector<16x128xf32>
    tpu.vector_store %arg8[%c0_17, %c0_18], %21 {strides = array<i32>} : memref<16x128xf32, #tpu.memory_space<vmem>>, vector<16x128xf32>,
    return
  }
  func.func @transform_0(%arg0: i32) -> (i32, i32) {
    %c0_i32 = arith.constant 0 : i32
    %c0_i32_0 = arith.constant 0 : i32
    return %arg0, %c0_i32 : i32, i32
  }
  func.func @transform_1(%arg0: i32) -> (i32, i32) {
    %c0_i32 = arith.constant 0 : i32
    %c0_i32_0 = arith.constant 0 : i32
    %c0_i32_1 = arith.constant 0 : i32
    return %c0_i32, %c0_i32_0 : i32, i32
  }
  func.func @transform_2(%arg0: i32) -> (i32, i32) {
    %c0_i32 = arith.constant 0 : i32
    %c0_i32_0 = arith.constant 0 : i32
    %c0_i32_1 = arith.constant 0 : i32
    return %c0_i32, %c0_i32_0 : i32, i32
  }
  func.func @transform_3(%arg0: i32) -> (i32, i32) {
    %c0_i32 = arith.constant 0 : i32
    %c0_i32_0 = arith.constant 0 : i32
    %c0_i32_1 = arith.constant 0 : i32
    return %c0_i32, %c0_i32_0 : i32, i32
  }
  func.func @transform_4(%arg0: i32) -> (i32, i32) {
    %c0_i32 = arith.constant 0 : i32
    %c0_i32_0 = arith.constant 0 : i32
    %c0_i32_1 = arith.constant 0 : i32
    return %c0_i32, %c0_i32_0 : i32, i32
  }
  func.func @transform_5(%arg0: i32) -> (i32, i32) {
    %c0_i32 = arith.constant 0 : i32
    %c0_i32_0 = arith.constant 0 : i32
    %c0_i32_1 = arith.constant 0 : i32
    return %c0_i32, %c0_i32_0 : i32, i32
  }
  func.func @transform_6(%arg0: i32) -> (i32, i32) {
    %c0_i32 = arith.constant 0 : i32
    %c0_i32_0 = arith.constant 0 : i32
    %c0_i32_1 = arith.constant 0 : i32
    return %c0_i32, %c0_i32_0 : i32, i32
  }
  func.func @transform_7(%arg0: i32) -> (i32, i32) {
    %c0_i32 = arith.constant 0 : i32
    %c0_i32_0 = arith.constant 0 : i32
    return %arg0, %c0_i32 : i32, i32
  }
}

</mosaic_0001>

<bundles_post_ra>
// kernel: mnist_2nn_forward.1
= control target key start
LH: loop header
LB: loop body
LE: loop exit
PB: predicated region body
PF: predicated region fallthrough
CT: control target
= control target key end

     0   :  { %12 = vsyncpa [#allocation3], 0  ;;  %s2168_s0 = inlined_call_operand.hbm [shape: bf16[16,784], index: 0, kind: input, shape index: {}]   ;;  %s2169_s1 = inlined_call_operand.hbm [shape: bf16[784,256], index: 1, kind: input, shape index: {}]   ;;  %s2170_s2 = inlined_call_operand.hbm [shape: f32[1,256], index: 2, kind: input, shape index: {}]   ;;  %s2171_s3 = inlined_call_operand.hbm [shape: bf16[256,256], index: 3, kind: input, shape index: {}]   ;;  %s2172_s4 = inlined_call_operand.hbm [shape: f32[1,256], index: 4, kind: input, shape index: {}]   ;;  %s2173_s5 = inlined_call_operand.hbm [shape: bf16[256,128], index: 5, kind: input, shape index: {}]   ;;  %s2174_s6 = inlined_call_operand.hbm [shape: f32[1,128], index: 6, kind: input, shape index: {}]   ;;  %s2175_s7 = inlined_call_operand.hbm [shape: f32[16,128], index: 7, kind: output, shape index: {}]  }
   0x1   :  { %13 = vsyncpa [#allocation6], 0 }
   0x2   :  { %14 = vsyncpa [#allocation9], 0 }
   0x3   :  { %15 = vsyncpa [#allocation12], 0 }
   0x4   :  { %16 = vsyncpa [#allocation4], 0  ;;  %s2008_s24 = smov [#allocation5]   ;;  %s1822_s28 = scalar_lea.hbm %s2169_s1, 12544 }
   0x5   :  { %s34_s25 = sshll.u32 %s2008_s24, 4  ;;  %p1823_p0 = scmp.ne.s32.totalorder %s2169_s1, %s1822_s28  ;;  %s35_s25 = int_to_ptr.vmem [resolvable:$true] %s34_s25 }
   0x6   :  { %p1826_p1 = scmp.lt.u32.totalorder %s1822_s28, %s2169_s1 }
   0x8   :  { %p1828_p2 = pnand %p1826_p1, %p1823_p0 }
   0xa   :  { %1831 = shalt.err (!%p1828_p2)
}
   0xb   :  { %s1832_s10 = scalar_lea.vmem %s35_s25, 12544  ;;  %p1837_p4 = scmp.lt.s32.totalorder %s35_s25, %s35_s25 }
   0xc   :  { %p1833_p3 = scmp.ne.s32.totalorder %s35_s25, %s1832_s10  ;;  %p1838_p5 = scmp.lt.s32.totalorder %s1832_s10, %s1832_s10 }
   0xe   :  { %p1839_p6 = por %p1838_p5, %p1837_p4 }
  0x10   :  { %p1840_p7 = pnand %p1839_p6, %p1833_p3 }
  0x12   :  { %1843 = shalt.err (!%p1840_p7)
}
  0x13   :  { %s2009_s11 = smov 128   ;;  %s2010_s12 = smov 8  }
  0x14   :  { %40 = dma.hbm_to_vmem [thread:$0]  %s2169_s1, 12544, %s35_s25, [#allocation6], %s2009_s11, %s2009_s11, %s2010_s12  }
  0x15   :  { %s2011_s15 = smov [#allocation8]   ;;  %s2012_s17 = smov [#allocation11]  }
  0x16   :  { %s56_s16 = sshll.u32 %s2011_s15, 4  ;;  %s78_s18 = sshll.u32 %s2012_s17, 4  ;;  %s57_s16 = int_to_ptr.vmem [resolvable:$true] %s56_s16  ;;  %s79_s18 = int_to_ptr.vmem [resolvable:$true] %s78_s18 }
  0x17   :  { %s1844_s21 = scalar_lea.hbm %s2171_s3, 4096 }
  0x18   :  { %p1845_p8 = scmp.ne.s32.totalorder %s2171_s3, %s1844_s21  ;;  %p1848_p9 = scmp.lt.u32.totalorder %s1844_s21, %s2171_s3 }
  0x1a   :  { %p1850_p10 = pnand %p1848_p9, %p1845_p8 }
  0x1c   :  { %1853 = shalt.err (!%p1850_p10)
}
  0x1d   :  { %s1854_s1 = scalar_lea.vmem %s57_s16, 4096  ;;  %p1859_p12 = scmp.lt.s32.totalorder %s57_s16, %s57_s16 }
  0x1e   :  { %p1855_p11 = scmp.ne.s32.totalorder %s57_s16, %s1854_s1  ;;  %p1860_p13 = scmp.lt.s32.totalorder %s1854_s1, %s1854_s1 }
  0x20   :  { %p1861_p0 = por %p1860_p13, %p1859_p12 }
  0x22   :  { %p1862_p1 = pnand %p1861_p0, %p1855_p11 }
  0x24   :  { %1865 = shalt.err (!%p1862_p1)
}
  0x25   :  { %62 = dma.hbm_to_vmem [thread:$0]  %s2171_s3, 4096, %s57_s16, [#allocation9], %s2009_s11, %s2009_s11, %s2010_s12  }
  0x26   :  { %s1866_s30 = scalar_lea.hbm %s2173_s5, 2048 }
  0x27   :  { %p1867_p2 = scmp.ne.s32.totalorder %s2173_s5, %s1866_s30  ;;  %p1870_p3 = scmp.lt.u32.totalorder %s1866_s30, %s2173_s5 }
  0x29   :  { %p1872_p4 = pnand %p1870_p3, %p1867_p2 }
  0x2b   :  { %1875 = shalt.err (!%p1872_p4)
}
  0x2c   :  { %s1876_s14 = scalar_lea.vmem %s79_s18, 2048  ;;  %p1881_p6 = scmp.lt.s32.totalorder %s79_s18, %s79_s18 }
  0x2d   :  { %p1877_p5 = scmp.ne.s32.totalorder %s79_s18, %s1876_s14  ;;  %p1882_p7 = scmp.lt.s32.totalorder %s1876_s14, %s1876_s14 }
  0x2f   :  { %p1883_p8 = por %p1882_p7, %p1881_p6 }
  0x31   :  { %p1884_p9 = pnand %p1883_p8, %p1877_p5 }
  0x33   :  { %1887 = shalt.err (!%p1884_p9)
}
  0x34   :  { %s2013_s3 = smov 64   ;;  %s2014_s15 = smov 4  }
  0x35   :  { %84 = dma.hbm_to_vmem [thread:$0]  %s2173_s5, 2048, %s79_s18, [#allocation12], %s2013_s3, %s2013_s3, %s2014_s15  }
  0x36   :  { %s2015_s19 = smov [#allocation2]   ;;  %s1888_s23 = scalar_lea.hbm %s2168_s0, 896 }
  0x37   :  { %s22_s20 = sshll.u32 %s2015_s19, 4  ;;  %p1889_p10 = scmp.ne.s32.totalorder %s2168_s0, %s1888_s23  ;;  %s23_s20 = int_to_ptr.vmem [resolvable:$true] %s22_s20 }
  0x38   :  { %p1892_p11 = scmp.lt.u32.totalorder %s1888_s23, %s2168_s0 }
  0x3a   :  { %p1894_p12 = pnand %p1892_p11, %p1889_p10 }
  0x3c   :  { %1897 = shalt.err (!%p1894_p12)
}
  0x3d   :  { %s1898_s27 = scalar_lea.vmem %s23_s20, 896  ;;  %p1903_p0 = scmp.lt.s32.totalorder %s23_s20, %s23_s20 }
  0x3e   :  { %p1899_p13 = scmp.ne.s32.totalorder %s23_s20, %s1898_s27  ;;  %p1904_p1 = scmp.lt.s32.totalorder %s1898_s27, %s1898_s27 }
  0x40   :  { %p1905_p2 = por %p1904_p1, %p1903_p0 }
  0x42   :  { %p1906_p3 = pnand %p1905_p2, %p1899_p13 }
  0x44   :  { %1909 = shalt.err (!%p1906_p3)
}
  0x45   :  { %s2016_s5 = smov 448   ;;  %s2017_s18 = smov 28  }
  0x46   :  { %28 = dma.hbm_to_vmem [thread:$0]  %s2168_s0, 896, %s23_s20, [#allocation3], %s2016_s5, %s2016_s5, %s2017_s18  }
  0x47   :  { %s2018_s30 = smov [#allocation7]   ;;  %s2019_s9 = smov [#allocation10]  }
  0x48   :  { %s47_s8 = sshll.u32 %s2018_s30, 4  ;;  %s69_s10 = sshll.u32 %s2019_s9, 4  ;;  %s48_s8 = int_to_ptr.vmem [resolvable:$true] %s47_s8  ;;  %s70_s10 = int_to_ptr.vmem [resolvable:$true] %s69_s10 }
  0x49   :  { %s1910_s3 = scalar_lea.hbm %s2170_s2, 32 }
  0x4a   :  { %p1911_p4 = scmp.ne.s32.totalorder %s2170_s2, %s1910_s3  ;;  %p1914_p5 = scmp.lt.u32.totalorder %s1910_s3, %s2170_s2 }
  0x4c   :  { %p1916_p6 = pnand %p1914_p5, %p1911_p4 }
  0x4e   :  { %1919 = shalt.err (!%p1916_p6)
}
  0x4f   :  { %s1920_s0 = scalar_lea.vmem %s48_s8, 32  ;;  %p1925_p8 = scmp.lt.s32.totalorder %s48_s8, %s48_s8 }
  0x50   :  { %p1921_p7 = scmp.ne.s32.totalorder %s48_s8, %s1920_s0  ;;  %p1926_p9 = scmp.lt.s32.totalorder %s1920_s0, %s1920_s0 }
  0x52   :  { %p1927_p10 = por %p1926_p9, %p1925_p8 }
  0x54   :  { %p1928_p11 = pnand %p1927_p10, %p1921_p7 }
  0x56   :  { %1931 = shalt.err (!%p1928_p11)
}
  0x57   :  { %50 = dma.hbm_to_vmem [thread:$0]  %s2170_s2, 32, %s48_s8, [#allocation6]  }
  0x58   :  { %s1932_s24 = scalar_lea.hbm %s2172_s4, 32 }
  0x59   :  { %p1933_p12 = scmp.ne.s32.totalorder %s2172_s4, %s1932_s24  ;;  %p1936_p13 = scmp.lt.u32.totalorder %s1932_s24, %s2172_s4 }
  0x5b   :  { %p1938_p0 = pnand %p1936_p13, %p1933_p12 }
  0x5d   :  { %1941 = shalt.err (!%p1938_p0)
}
  0x5e   :  { %s1942_s5 = scalar_lea.vmem %s70_s10, 32  ;;  %p1947_p2 = scmp.lt.s32.totalorder %s70_s10, %s70_s10 }
  0x5f   :  { %p1943_p1 = scmp.ne.s32.totalorder %s70_s10, %s1942_s5  ;;  %p1948_p3 = scmp.lt.s32.totalorder %s1942_s5, %s1942_s5 }
  0x61   :  { %p1949_p4 = por %p1948_p3, %p1947_p2 }
  0x63   :  { %p1950_p5 = pnand %p1949_p4, %p1943_p1 }
  0x65   :  { %1953 = shalt.err (!%p1950_p5)
}
  0x66   :  { %72 = dma.hbm_to_vmem [thread:$0]  %s2172_s4, 32, %s70_s10, [#allocation9]  }
  0x67   :  { %s2020_s28 = smov [#allocation13]   ;;  %s1954_s9 = scalar_lea.hbm %s2174_s6, 16 }
  0x68   :  { %s91_s29 = sshll.u32 %s2020_s28, 4  ;;  %p1955_p6 = scmp.ne.s32.totalorder %s2174_s6, %s1954_s9  ;;  %s92_s29 = int_to_ptr.vmem [resolvable:$true] %s91_s29 }
  0x69   :  { %p1958_p7 = scmp.lt.u32.totalorder %s1954_s9, %s2174_s6 }
  0x6b   :  { %p1960_p8 = pnand %p1958_p7, %p1955_p6 }
  0x6d   :  { %1963 = shalt.err (!%p1960_p8)
}
  0x6e   :  { %s1964_s16 = scalar_lea.vmem %s92_s29, 16  ;;  %s1968_s4 = scalar_lea.vmem %s92_s29, 32 }
  0x6f   :  { %p1965_p9 = scmp.ne.s32.totalorder %s92_s29, %s1964_s16  ;;  %p1969_p10 = scmp.lt.s32.totalorder %s92_s29, %s92_s29 }
  0x70   :  { %p1970_p11 = scmp.lt.s32.totalorder %s1968_s4, %s1964_s16 }
  0x72   :  { %p1971_p12 = por %p1970_p11, %p1969_p10 }
  0x74   :  { %p1972_p13 = pnand %p1971_p12, %p1965_p9 }
  0x76   :  { %1975 = shalt.err (!%p1972_p13)
}
  0x77   :  { %94 = dma.hbm_to_vmem [thread:$0]  %s2174_s6, 16, %s92_s29, [#allocation12]  }
  0x78   :  { %1998 = dma.done.wait [#allocation3], 896  }
  0x79   :  { %1999 = vsyncadd [#allocation3], 4294966400 }
  0x7a   :  { %2000 = dma.done.wait [#allocation6], 12576  }
  0x7b   :  { %2001 = vsyncadd [#allocation6], 4294954720 }
  0x7c   :  { %2002 = dma.done.wait [#allocation9], 4128  }
  0x7d   :  { %2003 = vsyncadd [#allocation9], 4294963168 }
  0x7e   :  { %2004 = dma.done.wait [#allocation12], 2064  }
  0x7f   :  { %2005 = vsyncadd [#allocation12], 4294965232  ;;  %v1601_v0 = vld [vmem:[#allocation5 + $0x104] ss:$8 sps:$4 sm:$0xff]   ;;  %v1603_v1 = vld [vmem:[#allocation5 + $0x100] ss:$8 sps:$4 sm:$0xff]  }
  0x80   :  { %807 = vmatprep.subr.bf16.mxu0 %v1601_v0  ;;  %v1604_v2 = vld [vmem:[#allocation5 + $0x114] ss:$8 sps:$4 sm:$0xff]   ;;  %v1606_v3 = vld [vmem:[#allocation5 + $0x110] ss:$8 sps:$4 sm:$0xff]   ;;  %v1607_v4 = vld [vmem:[#allocation5 + $0x124] ss:$8 sps:$4 sm:$0xff]  }
  0x81   :  { %808 = vmatpush1.bf16.msra.mxu0 %v1603_v1  ;;  %v1609_v5 = vld [vmem:[#allocation5 + $0x120] ss:$8 sps:$4 sm:$0xff]   ;;  %v1610_v6 = vld [vmem:[#allocation5 + $0x134] ss:$8 sps:$4 sm:$0xff]   ;;  %v1612_v7 = vld [vmem:[#allocation5 + $0x130] ss:$8 sps:$4 sm:$0xff]  }
  0x82   :  { %809 = vmatprep.subr.bf16.mxu0 %v1604_v2  ;;  %v1613_v8 = vld [vmem:[#allocation5 + $0x144] ss:$8 sps:$4 sm:$0xff]   ;;  %v1615_v9 = vld [vmem:[#allocation5 + $0x140] ss:$8 sps:$4 sm:$0xff]   ;;  %v1616_v10 = vld [vmem:[#allocation5 + $0x154] ss:$8 sps:$4 sm:$0xff]  }
  0x83   :  { %v1618_v11 = vld [vmem:[#allocation5 + $0x150] ss:$8 sps:$4 sm:$0xff]   ;;  %v1619_v12 = vld [vmem:[#allocation5 + $0x164] ss:$8 sps:$4 sm:$0xff]   ;;  %v1621_v14 = vld [vmem:[#allocation5 + $0x160] ss:$8 sps:$4 sm:$0xff]  }
  0x84   :  { %v1651_v13 = vld [vmem:[#allocation2 + $0xc] ss:$28 sps:$4 sm:$0xff]   ;;  %v1658_v16 = vld [vmem:[#allocation5 + $0x4] ss:$8 sps:$4 sm:$0xff]   ;;  %v1663_v19 = vld [vmem:[#allocation5] ss:$8 sps:$4 sm:$0xff]  }
  0x85   :  { %810 = vmatpush1.bf16.msra.mxu0 %v1606_v3  ;;  %v1622_v15 = vld [vmem:[#allocation5 + $0x174] ss:$8 sps:$4 sm:$0xff]   ;;  %839 = vmatprep.mubr.bf16.mxu0 %v1651_v13  ;;  %v1624_v17 = vld [vmem:[#allocation5 + $0x170] ss:$8 sps:$4 sm:$0xff]   ;;  %v1625_v18 = vld [vmem:[#allocation5 + $0x184] ss:$8 sps:$4 sm:$0xff]  }
  0x86   :  { %811 = vmatprep.subr.bf16.mxu0 %v1607_v4  ;;  %764 = vmatprep.subr.bf16.mxu1 %v1658_v16  ;;  %v1664_v20 = vld [vmem:[#allocation5 + $0x14] ss:$8 sps:$4 sm:$0xff]   ;;  %v1627_v21 = vld [vmem:[#allocation5 + $0x180] ss:$8 sps:$4 sm:$0xff]   ;;  %v1669_v22 = vld [vmem:[#allocation5 + $0x10] ss:$8 sps:$4 sm:$0xff]  }
  0x87   :  { %765 = vmatpush1.bf16.msra.mxu1 %v1663_v19  ;;  %v1670_v23 = vld [vmem:[#allocation5 + $0x24] ss:$8 sps:$4 sm:$0xff]   ;;  %v1628_v24 = vld [vmem:[#allocation5 + $0x194] ss:$8 sps:$4 sm:$0xff]   ;;  %v1675_v25 = vld [vmem:[#allocation5 + $0x20] ss:$8 sps:$4 sm:$0xff]  }
  0x88   :  { %766 = vmatprep.subr.bf16.mxu1 %v1664_v20  ;;  %v1676_v26 = vld [vmem:[#allocation5 + $0x34] ss:$8 sps:$4 sm:$0xff]   ;;  %v1630_v27 = vld [vmem:[#allocation5 + $0x190] ss:$8 sps:$4 sm:$0xff]   ;;  %v1631_v28 = vld [vmem:[#allocation5 + $0x1a4] ss:$8 sps:$4 sm:$0xff]  }
  0x89   :  { %812 = vmatpush1.bf16.msra.mxu0 %v1609_v5  ;;  %v1681_v29 = vld [vmem:[#allocation5 + $0x30] ss:$8 sps:$4 sm:$0xff]   ;;  %v1682_v30 = vld [vmem:[#allocation5 + $0x44] ss:$8 sps:$4 sm:$0xff]   ;;  %v1633_v31 = vld [vmem:[#allocation5 + $0x1a0] ss:$8 sps:$4 sm:$0xff]  }
  0x8a   :  { %813 = vmatprep.subr.bf16.mxu0 %v1610_v6  ;;  %v1634_v32 = vld [vmem:[#allocation5 + $0x1b4] ss:$8 sps:$4 sm:$0xff]   ;;  %v1687_v33 = vld [vmem:[#allocation5 + $0x40] ss:$8 sps:$4 sm:$0xff]   ;;  %v1636_v35 = vld [vmem:[#allocation5 + $0x1b0] ss:$8 sps:$4 sm:$0xff]  }
  0x8b   :  { %767 = vmatpush1.bf16.msra.mxu1 %v1669_v22  ;;  %v1688_v34 = vld [vmem:[#allocation5 + $0x54] ss:$8 sps:$4 sm:$0xff]   ;;  %v1637_v36 = vld [vmem:[#allocation5 + $0x1c4] ss:$8 sps:$4 sm:$0xff]   ;;  %v1693_v37 = vld [vmem:[#allocation5 + $0x50] ss:$8 sps:$4 sm:$0xff]  }
  0x8c   :  { %768 = vmatprep.subr.bf16.mxu1 %v1670_v23  ;;  %v1694_v38 = vld [vmem:[#allocation5 + $0x64] ss:$8 sps:$4 sm:$0xff]   ;;  %v1639_v39 = vld [vmem:[#allocation5 + $0x1c0] ss:$8 sps:$4 sm:$0xff]   ;;  %v1640_v40 = vld [vmem:[#allocation5 + $0x1d4] ss:$8 sps:$4 sm:$0xff]  }
  0x8d   :  { %814 = vmatpush1.bf16.msra.mxu0 %v1612_v7  ;;  %v1699_v41 = vld [vmem:[#allocation5 + $0x60] ss:$8 sps:$4 sm:$0xff]   ;;  %v1700_v42 = vld [vmem:[#allocation5 + $0x74] ss:$8 sps:$4 sm:$0xff]   ;;  %v1642_v43 = vld [vmem:[#allocation5 + $0x1d0] ss:$8 sps:$4 sm:$0xff]  }
  0x8e   :  { %815 = vmatprep.subr.bf16.mxu0 %v1613_v8  ;;  %v1643_v44 = vld [vmem:[#allocation5 + $0x1e4] ss:$8 sps:$4 sm:$0xff]   ;;  %v1705_v45 = vld [vmem:[#allocation5 + $0x70] ss:$8 sps:$4 sm:$0xff]   ;;  %v1645_v47 = vld [vmem:[#allocation5 + $0x1e0] ss:$8 sps:$4 sm:$0xff]  }
  0x8f   :  { %769 = vmatpush1.bf16.msra.mxu1 %v1675_v25  ;;  %v1706_v46 = vld [vmem:[#allocation5 + $0x84] ss:$8 sps:$4 sm:$0xff]   ;;  %v1646_v48 = vld [vmem:[#allocation5 + $0x1f4] ss:$8 sps:$4 sm:$0xff]   ;;  %v1711_v49 = vld [vmem:[#allocation5 + $0x80] ss:$8 sps:$4 sm:$0xff]  }
  0x90   :  { %770 = vmatprep.subr.bf16.mxu1 %v1676_v26  ;;  %v1712_v50 = vld [vmem:[#allocation5 + $0x94] ss:$8 sps:$4 sm:$0xff]   ;;  %v1648_v51 = vld [vmem:[#allocation5 + $0x1f0] ss:$8 sps:$4 sm:$0xff]   ;;  %v1654_v52 = vld [vmem:[#allocation5 + $0x204] ss:$8 sps:$4 sm:$0xff]  }
  0x91   :  { %816 = vmatpush1.bf16.msra.mxu0 %v1615_v9  ;;  %v1717_v53 = vld [vmem:[#allocation5 + $0x90] ss:$8 sps:$4 sm:$0xff]   ;;  %v1718_v55 = vld [vmem:[#allocation5 + $0xa4] ss:$8 sps:$4 sm:$0xff]   ;;  %v1652_v56 = vld [vmem:[#allocation5 + $0x200] ss:$8 sps:$4 sm:$0xff]  }
  0x92   :  { %817 = vmatprep.subr.bf16.mxu0 %v1616_v10  ;;  %v1649_v54 = vld [vmem:[#allocation2 + $0x8] ss:$28 sps:$4 sm:$0xff]   ;;  %v1744_v57 = vld [vmem:[#allocation2 + $0x14] ss:$28 sps:$4 sm:$0xff]   ;;  %v1723_v59 = vld [vmem:[#allocation5 + $0xa0] ss:$8 sps:$4 sm:$0xff]  }
  0x93   :  { %771 = vmatpush1.bf16.msra.mxu1 %v1681_v29  ;;  %v1657_v58 = vld [vmem:[#allocation5 + $0x214] ss:$8 sps:$4 sm:$0xff]   ;;  %v1655_v61 = vld [vmem:[#allocation5 + $0x210] ss:$8 sps:$4 sm:$0xff]   ;;  %v1662_v62 = vld [vmem:[#allocation5 + $0x224] ss:$8 sps:$4 sm:$0xff]  }
  0x94   :  { %772 = vmatprep.subr.bf16.mxu1 %v1682_v30  ;;  %v1724_v60 = vld [vmem:[#allocation5 + $0xb4] ss:$8 sps:$4 sm:$0xff]   ;;  %v1729_v63 = vld [vmem:[#allocation5 + $0xb0] ss:$8 sps:$4 sm:$0xff]   ;;  %v1756_v0 = vld [vmem:[#allocation2 + $0x4] ss:$28 sps:$4 sm:$0xff]  }
  0x95   :  { %818 = vmatpush1.bf16.msra.mxu0 %v1618_v11  ;;  %v1730_v1 = vld [vmem:[#allocation5 + $0xc4] ss:$8 sps:$4 sm:$0xff]   ;;  %v1660_v2 = vld [vmem:[#allocation5 + $0x220] ss:$8 sps:$4 sm:$0xff]   ;;  %796 = vmatprep.mubr.bf16.mxu1 %v1756_v0  ;;  %v1668_v3 = vld [vmem:[#allocation5 + $0x234] ss:$8 sps:$4 sm:$0xff]  }
  0x96   :  { %819 = vmatprep.subr.bf16.mxu0 %v1619_v12  ;;  %v1735_v4 = vld [vmem:[#allocation5 + $0xc0] ss:$8 sps:$4 sm:$0xff]   ;;  %v1736_v5 = vld [vmem:[#allocation5 + $0xd4] ss:$8 sps:$4 sm:$0xff]   ;;  %v1666_v6 = vld [vmem:[#allocation5 + $0x230] ss:$8 sps:$4 sm:$0xff]  }
  0x97   :  { %773 = vmatpush1.bf16.msra.mxu1 %v1687_v33  ;;  %v1674_v7 = vld [vmem:[#allocation5 + $0x244] ss:$8 sps:$4 sm:$0xff]   ;;  %v1741_v8 = vld [vmem:[#allocation5 + $0xd0] ss:$8 sps:$4 sm:$0xff]   ;;  %v1672_v10 = vld [vmem:[#allocation5 + $0x240] ss:$8 sps:$4 sm:$0xff]  }
  0x98   :  { %774 = vmatprep.subr.bf16.mxu1 %v1688_v34  ;;  %v1745_v9 = vld [vmem:[#allocation5 + $0xe4] ss:$8 sps:$4 sm:$0xff]   ;;  %v1680_v11 = vld [vmem:[#allocation5 + $0x254] ss:$8 sps:$4 sm:$0xff]   ;;  %v1750_v12 = vld [vmem:[#allocation5 + $0xe0] ss:$8 sps:$4 sm:$0xff]  }
  0x99   :  { %820 = vmatpush1.bf16.msra.mxu0 %v1621_v14  ;;  %v1751_v13 = vld [vmem:[#allocation5 + $0xf4] ss:$8 sps:$4 sm:$0xff]   ;;  %v1678_v14 = vld [vmem:[#allocation5 + $0x250] ss:$8 sps:$4 sm:$0xff]   ;;  %v1684_v16 = vld [vmem:[#allocation5 + $0x260] ss:$8 sps:$4 sm:$0xff]  }
  0x9a   :  { %821 = vmatprep.subr.bf16.mxu0 %v1622_v15  ;;  %v1686_v15 = vld [vmem:[#allocation5 + $0x264] ss:$8 sps:$4 sm:$0xff]   ;;  %v1692_v19 = vld [vmem:[#allocation5 + $0x274] ss:$8 sps:$4 sm:$0xff]   ;;  %v1690_v23 = vld [vmem:[#allocation5 + $0x270] ss:$8 sps:$4 sm:$0xff]  }
  0x9b   :  { %775 = vmatpush1.bf16.msra.mxu1 %v1693_v37  ;;  %v1754_v20 = vld [vmem:[#allocation2] ss:$28 sps:$4 sm:$0xff]   ;;  %v1766_v26 = vld [vmem:[#allocation8 + $0x24] ss:$8 sps:$4 sm:$0xff]   ;;  %v1764_v29 = vld [vmem:[#allocation8 + $0x20] ss:$8 sps:$4 sm:$0xff]  }
  0x9c   :  { %776 = vmatprep.subr.bf16.mxu1 %v1694_v38  ;;  %v1763_v22 = vld [vmem:[#allocation8 + $0x14] ss:$8 sps:$4 sm:$0xff]   ;;  %v1761_v25 = vld [vmem:[#allocation8 + $0x10] ss:$8 sps:$4 sm:$0xff]   ;;  %v1772_v34 = vld [vmem:[#allocation8 + $0x44] ss:$8 sps:$4 sm:$0xff]  }
  0x9d   :  { %822 = vmatpush1.bf16.msra.mxu0 %v1624_v17  ;;  %v1753_v17 = vld [vmem:[#allocation5 + $0xf0] ss:$8 sps:$4 sm:$0xff]   ;;  %v1767_v33 = vld [vmem:[#allocation8 + $0x30] ss:$8 sps:$4 sm:$0xff]   ;;  %vm760_vm0 = vcmask 130048   ;;  %s2022_s6 = smov [#allocation14]  }
  0x9e   :  { %823 = vmatprep.subr.bf16.mxu0 %v1625_v18  ;;  %v1760_v18 = vld [vmem:[#allocation8 + $0x4] ss:$8 sps:$4 sm:$0xff]   ;;  %v1769_v30 = vld [vmem:[#allocation8 + $0x34] ss:$8 sps:$4 sm:$0xff]   ;;  %v1770_v37 = vld [vmem:[#allocation8 + $0x40] ss:$8 sps:$4 sm:$0xff]  }
  0x9f   :  { %777 = vmatpush1.bf16.msra.mxu1 %v1699_v41  ;;  %v1775_v38 = vld [vmem:[#allocation8 + $0x54] ss:$8 sps:$4 sm:$0xff]   ;;  %v1773_v41 = vld [vmem:[#allocation8 + $0x50] ss:$8 sps:$4 sm:$0xff]   ;;  %s1378_s19 = sshll.u32 %s2022_s6, 4  ;;  %s1379_s19 = int_to_ptr.vmem [resolvable:$true] %s1378_s19 }
  0xa0   :  { %778 = vmatprep.subr.bf16.mxu1 %v1700_v42  ;;  %v1778_v42 = vld [vmem:[#allocation8 + $0x64] ss:$8 sps:$4 sm:$0xff]   ;;  %v1791_v0 = vld [vmem:[#allocation8 + $0xb0] ss:$8 sps:$4 sm:$0xff]   ;;  %s1976_s0 = scalar_lea.vmem %s1379_s19, 256  ;;  %p1981_p1 = scmp.lt.s32.totalorder %s1379_s19, %s1379_s19 }
  0xa1   :  { %824 = vmatpush1.bf16.msra.mxu0 %v1627_v21  ;;  %v1758_v21 = vld [vmem:[#allocation8] ss:$8 sps:$4 sm:$0xff]   ;;  %p1977_p0 = scmp.ne.s32.totalorder %s1379_s19, %s1976_s0  ;;  %p1982_p2 = scmp.lt.s32.totalorder %s1976_s0, %s1976_s0 }
  0xa2   :  { %825 = vmatprep.subr.bf16.mxu0 %v1628_v24  ;;  %v1698_v24 = vld [vmem:[#allocation5 + $0x284] ss:$8 sps:$4 sm:$0xff]  }
  0xa3   :  { %779 = vmatpush1.bf16.msra.mxu1 %v1705_v45  ;;  %v1776_v45 = vld [vmem:[#allocation8 + $0x60] ss:$8 sps:$4 sm:$0xff]   ;;  %p1983_p3 = por %p1982_p2, %p1981_p1 }
  0xa4   :  { %780 = vmatprep.subr.bf16.mxu1 %v1706_v46  ;;  %v1781_v46 = vld [vmem:[#allocation8 + $0x74] ss:$8 sps:$4 sm:$0xff]  }
  0xa5   :  { %826 = vmatpush1.bf16.msra.mxu0 %v1630_v27  ;;  %v1696_v27 = vld [vmem:[#allocation5 + $0x280] ss:$8 sps:$4 sm:$0xff]   ;;  %p1984_p4 = pnand %p1983_p3, %p1977_p0 }
  0xa6   :  { %827 = vmatprep.subr.bf16.mxu0 %v1631_v28  ;;  %v1704_v28 = vld [vmem:[#allocation5 + $0x294] ss:$8 sps:$4 sm:$0xff]  }
  0xa7   :  { %781 = vmatpush1.bf16.msra.mxu1 %v1711_v49  ;;  %v1779_v49 = vld [vmem:[#allocation8 + $0x70] ss:$8 sps:$4 sm:$0xff]  }
  0xa8   :  { %782 = vmatprep.subr.bf16.mxu1 %v1712_v50  ;;  %v1784_v50 = vld [vmem:[#allocation8 + $0x84] ss:$8 sps:$4 sm:$0xff]  }
  0xa9   :  { %828 = vmatpush1.bf16.msra.mxu0 %v1633_v31  ;;  %v1702_v31 = vld [vmem:[#allocation5 + $0x290] ss:$8 sps:$4 sm:$0xff]  }
  0xaa   :  { %829 = vmatprep.subr.bf16.mxu0 %v1634_v32  ;;  %v1710_v32 = vld [vmem:[#allocation5 + $0x2a4] ss:$8 sps:$4 sm:$0xff]  }
  0xab   :  { %783 = vmatpush1.bf16.msra.mxu1 %v1717_v53  ;;  %v1782_v53 = vld [vmem:[#allocation8 + $0x80] ss:$8 sps:$4 sm:$0xff]  }
  0xac   :  { %784 = vmatprep.subr.bf16.mxu1 %v1718_v55  ;;  %v1738_v55 = vld [vmem:[#allocation5 + $0x2f0] ss:$8 sps:$4 sm:$0xff]  }
  0xad   :  { %830 = vmatpush1.bf16.msra.mxu0 %v1636_v35  ;;  %v1708_v35 = vld [vmem:[#allocation5 + $0x2a0] ss:$8 sps:$4 sm:$0xff]  }
  0xae   :  { %831 = vmatprep.subr.bf16.mxu0 %v1637_v36  ;;  %v1716_v36 = vld [vmem:[#allocation5 + $0x2b4] ss:$8 sps:$4 sm:$0xff]  }
  0xaf   :  { %785 = vmatpush1.bf16.msra.mxu1 %v1723_v59  ;;  %v1790_v59 = vld [vmem:[#allocation8 + $0xa4] ss:$8 sps:$4 sm:$0xff]  }
  0xb0   :  { %786 = vmatprep.subr.bf16.mxu1 %v1724_v60  ;;  %v1747_v60 = vld [vmem:[#allocation5 + $0x300] ss:$8 sps:$4 sm:$0xff]  }
  0xb1   :  { %832 = vmatpush1.bf16.msra.mxu0 %v1639_v39  ;;  %v1714_v39 = vld [vmem:[#allocation5 + $0x2b0] ss:$8 sps:$4 sm:$0xff]  }
  0xb2   :  { %833 = vmatprep.subr.bf16.mxu0 %v1640_v40  ;;  %v1722_v40 = vld [vmem:[#allocation5 + $0x2c4] ss:$8 sps:$4 sm:$0xff]  }
  0xb3   :  { %787 = vmatpush1.bf16.msra.mxu1 %v1729_v63  ;;  %v2021_v63 = vmov 0  }
  0xb4   :  { %788 = vmatprep.subr.bf16.mxu1 %v1730_v1  ;;  %v1796_v1 = vld [vmem:[#allocation8 + $0xc4] ss:$8 sps:$4 sm:$0xff]  }
  0xb5   :  { %834 = vmatpush1.bf16.msra.mxu0 %v1642_v43  ;;  %v1720_v43 = vld [vmem:[#allocation5 + $0x2c0] ss:$8 sps:$4 sm:$0xff]  }
  0xb6   :  { %835 = vmatprep.subr.bf16.mxu0 %v1643_v44  ;;  %v1728_v44 = vld [vmem:[#allocation5 + $0x2d4] ss:$8 sps:$4 sm:$0xff]  }
  0xb7   :  { %789 = vmatpush1.bf16.msra.mxu1 %v1735_v4  ;;  %v1797_v4 = vld [vmem:[#allocation8 + $0xd0] ss:$8 sps:$4 sm:$0xff]  }
  0xb8   :  { %790 = vmatprep.subr.bf16.mxu1 %v1736_v5  ;;  %v1799_v5 = vld [vmem:[#allocation8 + $0xd4] ss:$8 sps:$4 sm:$0xff]  }
  0xb9   :  { %836 = vmatpush1.bf16.msra.mxu0 %v1645_v47  ;;  %v1726_v47 = vld [vmem:[#allocation5 + $0x2d0] ss:$8 sps:$4 sm:$0xff]  }
  0xba   :  { %837 = vmatprep.subr.bf16.mxu0 %v1646_v48  ;;  %v1734_v48 = vld [vmem:[#allocation5 + $0x2e4] ss:$8 sps:$4 sm:$0xff]  }
  0xbb   :  { %791 = vmatpush1.bf16.msra.mxu1 %v1741_v8  ;;  %v1805_v8 = vld [vmem:[#allocation8 + $0xf4] ss:$8 sps:$4 sm:$0xff]  }
  0xbc   :  { %792 = vmatprep.subr.bf16.mxu1 %v1745_v9  ;;  %v1803_v9 = vld [vmem:[#allocation8 + $0xf0] ss:$8 sps:$4 sm:$0xff]  }
  0xbd   :  { %838 = vmatpush1.bf16.msra.mxu0 %v1648_v51  ;;  %v1732_v51 = vld [vmem:[#allocation5 + $0x2e0] ss:$8 sps:$4 sm:$0xff]  }
  0xbe   :  { %850 = vmatprep.subr.bf16.mxu0 %v1654_v52  ;;  %v1740_v52 = vld [vmem:[#allocation5 + $0x2f4] ss:$8 sps:$4 sm:$0xff]  }
  0xbf   :  { %793 = vmatpush1.bf16.msra.mxu1 %v1750_v12 }
  0xc0   :  { %840 = vmatmul.mubr.bf16.vlgmr.msra.gmra.mrb[0].mxu0 %v1649_v54  ;;  %794 = vmatprep.subr.bf16.mxu1 %v1751_v13  ;;  %v1787_v54 = vld [vmem:[#allocation8 + $0x94] ss:$8 sps:$4 sm:$0xff]  }
  0xc1   :  { %851 = vmatpush1.bf16.msra.mxu0 %v1652_v56  ;;  %882 = vmatprep.mubr.bf16.mxu0 %v1744_v57  ;;  %v1749_v56 = vld [vmem:[#allocation5 + $0x304] ss:$8 sps:$4 sm:$0xff]  }
  0xc2   :  { %852 = vmatprep.subr.bf16.mxu0 %v1657_v58  ;;  %v1785_v57 = vld [vmem:[#allocation8 + $0x90] ss:$8 sps:$4 sm:$0xff]   ;;  %v1742_v58 = vld [vmem:[#allocation2 + $0x10] ss:$28 sps:$4 sm:$0xff]  }
  0xc3   :  { %795 = vmatpush1.bf16.msra.mxu1 %v1753_v17 }
  0xc4   :  { %1146 = vmatprep.subr.bf16.mxu1 %v1760_v18  ;;  %v223_v18 = vld [vmem:[#allocation7] sm:$0x3] }
  0xc5   :  { %853 = vmatpush1.bf16.msra.mxu0 %v1655_v61  ;;  %v1788_v61 = vld [vmem:[#allocation8 + $0xa0] ss:$8 sps:$4 sm:$0xff]  }
  0xc6   :  { %854 = vmatprep.subr.bf16.mxu0 %v1662_v62  ;;  %797 = vmatmul.mubr.bf16.vlgmr.msra.gmra.mrb[0].mxu1 %v1754_v20  ;;  %v1793_v62 = vld [vmem:[#allocation8 + $0xb4] ss:$8 sps:$4 sm:$0xff]  }
  0xc7   :  { %1147 = vmatpush1.bf16.msra.mxu1 %v1758_v21 }
  0xc8   :  { %1148 = vmatprep.subr.bf16.mxu1 %v1763_v22 }
  0xc9   :  { %855 = vmatpush1.bf16.msra.mxu0 %v1660_v2  ;;  %v1794_v2 = vld [vmem:[#allocation8 + $0xc0] ss:$8 sps:$4 sm:$0xff]  }
  0xca   :  { %856 = vmatprep.subr.bf16.mxu0 %v1668_v3  ;;  %v1757_v3 = vld [vmem:[#allocation2 + $0x18] ss:$28 sps:$4 sm:$0xff]  }
  0xcb   :  { %1149 = vmatpush1.bf16.msra.mxu1 %v1761_v25 }
  0xcc   :  { %1150 = vmatprep.subr.bf16.mxu1 %v1766_v26 }
  0xcd   :  { %857 = vmatpush1.bf16.msra.mxu0 %v1666_v6  ;;  %v1802_v6 = vld [vmem:[#allocation8 + $0xe4] ss:$8 sps:$4 sm:$0xff]  }
  0xce   :  { %858 = vmatprep.subr.bf16.mxu0 %v1674_v7  ;;  %v1800_v7 = vld [vmem:[#allocation8 + $0xe0] ss:$8 sps:$4 sm:$0xff]  }
  0xcf   :  { %1151 = vmatpush1.bf16.msra.mxu1 %v1764_v29 }
  0xd0   :  { %1152 = vmatprep.subr.bf16.mxu1 %v1769_v30 }
  0xd1   :  { %859 = vmatpush1.bf16.msra.mxu0 %v1672_v10  ;;  %v1806_v10 = vld [vmem:[#allocation11 + $0x40] sm:$0xff]  }
  0xd2   :  { %860 = vmatprep.subr.bf16.mxu0 %v1680_v11 }
  0xd3   :  { %1153 = vmatpush1.bf16.msra.mxu1 %v1767_v33 }
  0xd4   :  { %1154 = vmatprep.subr.bf16.mxu1 %v1772_v34 }
  0xd5   :  { %861 = vmatpush1.bf16.msra.mxu0 %v1678_v14 }
  0xd6   :  { %862 = vmatprep.subr.bf16.mxu0 %v1686_v15  ;;  %v225_v15 = vlaneseq }
  0xd7   :  { %1155 = vmatpush1.bf16.msra.mxu1 %v1770_v37 }
  0xd8   :  { %1156 = vmatprep.subr.bf16.mxu1 %v1775_v38 }
  0xd9   :  { %863 = vmatpush1.bf16.msra.mxu0 %v1684_v16  ;;  %v226_v16 = vshrl.u32 %v225_v15, 7 }
  0xda   :  { %864 = vmatprep.subr.bf16.mxu0 %v1692_v19 }
  0xdb   :  { %1157 = vmatpush1.bf16.msra.mxu1 %v1773_v41  ;;  %v227_v17 = vsub.s32 0, %v226_v16  ;;  %v231_v19 = vsub.s32 1, %v226_v16  ;;  %v1808_v41 = vld [vmem:[#allocation11 + $0x48] sm:$0xff]  }
  0xdc   :  { %1158 = vmatprep.subr.bf16.mxu1 %v1778_v42  ;;  %v1809_v42 = vld [vmem:[#allocation11 + $0x8] sm:$0xff]  }
  0xdd   :  { %865 = vmatpush1.bf16.msra.mxu0 %v1690_v23  ;;  %v228_v20 = vrot.slane %v223_v18, %v227_v17  ;;  %v232_v21 = vrot.slane %v223_v18, %v231_v19 }
  0xde   :  { %866 = vmatprep.subr.bf16.mxu0 %v1698_v24 }
  0xdf   :  { %1159 = vmatpush1.bf16.msra.mxu1 %v1776_v45  ;;  %v1812_v45 = vld [vmem:[#allocation11 + $0x58] sm:$0xff]  }
  0xe0   :  { %1160 = vmatprep.subr.bf16.mxu1 %v1781_v46  ;;  %v1813_v46 = vld [vmem:[#allocation11 + $0x18] sm:$0xff]  }
  0xe1   :  { %867 = vmatpush1.bf16.msra.mxu0 %v1696_v27 }
  0xe2   :  { %868 = vmatprep.subr.bf16.mxu0 %v1704_v28 }
  0xe3   :  { %1161 = vmatpush1.bf16.msra.mxu1 %v1779_v49  ;;  %v1816_v49 = vld [vmem:[#allocation11 + $0x68] sm:$0xff]  }
  0xe4   :  { %1162 = vmatprep.subr.bf16.mxu1 %v1784_v50  ;;  %v1817_v50 = vld [vmem:[#allocation11 + $0x28] sm:$0xff]  }
  0xe5   :  { %869 = vmatpush1.bf16.msra.mxu0 %v1702_v31 }
  0xe6   :  { %870 = vmatprep.subr.bf16.mxu0 %v1710_v32 }
  0xe7   :  { %1163 = vmatpush1.bf16.msra.mxu1 %v1782_v53  ;;  %v1820_v53 = vld [vmem:[#allocation11 + $0x78] sm:$0xff]  }
  0xe8   :  { %1164 = vmatprep.subr.bf16.mxu1 %v1787_v54  ;;  %v1821_v54 = vld [vmem:[#allocation11 + $0x38] sm:$0xff]  }
  0xe9   :  { %871 = vmatpush1.bf16.msra.mxu0 %v1708_v35 }
  0xea   :  { %872 = vmatprep.subr.bf16.mxu0 %v1716_v36 }
  0xeb   :  { %1165 = vmatpush1.bf16.msra.mxu1 %v1785_v57 }
  0xec   :  { %1166 = vmatprep.subr.bf16.mxu1 %v1790_v59 }
  0xed   :  { %873 = vmatpush1.bf16.msra.mxu0 %v1714_v39 }
  0xee   :  { %874 = vmatprep.subr.bf16.mxu0 %v1722_v40  ;;  %v1807_v40 = vld [vmem:[#allocation11] sm:$0xff]  }
  0xef   :  { %1167 = vmatpush1.bf16.msra.mxu1 %v1788_v61 }
  0xf0   :  { %1168 = vmatprep.subr.bf16.mxu1 %v1793_v62 }
  0xf1   :  { %875 = vmatpush1.bf16.msra.mxu0 %v1720_v43  ;;  %v1810_v43 = vld [vmem:[#allocation11 + $0x50] sm:$0xff]  }
  0xf2   :  { %876 = vmatprep.subr.bf16.mxu0 %v1728_v44  ;;  %v1811_v44 = vld [vmem:[#allocation11 + $0x10] sm:$0xff]  }
  0xf3   :  { %1169 = vmatpush1.bf16.msra.mxu1 %v1791_v0 }
  0xf4   :  { %1170 = vmatprep.subr.bf16.mxu1 %v1796_v1 }
  0xf5   :  { %877 = vmatpush1.bf16.msra.mxu0 %v1726_v47  ;;  %v1814_v47 = vld [vmem:[#allocation11 + $0x60] sm:$0xff]  }
  0xf6   :  { %878 = vmatprep.subr.bf16.mxu0 %v1734_v48  ;;  %v1815_v48 = vld [vmem:[#allocation11 + $0x20] sm:$0xff]  }
  0xf7   :  { %1171 = vmatpush1.bf16.msra.mxu1 %v1794_v2 }
  0xf8   :  { %1172 = vmatprep.subr.bf16.mxu1 %v1799_v5 }
  0xf9   :  { %879 = vmatpush1.bf16.msra.mxu0 %v1732_v51  ;;  %v1818_v51 = vld [vmem:[#allocation11 + $0x70] sm:$0xff]  }
  0xfa   :  { %880 = vmatprep.subr.bf16.mxu0 %v1740_v52  ;;  %v1819_v52 = vld [vmem:[#allocation11 + $0x30] sm:$0xff]  }
  0xfb   :  { %1173 = vmatpush1.bf16.msra.mxu1 %v1797_v4 }
  0xfc   :  { %1174 = vmatprep.subr.bf16.mxu1 %v1802_v6 }
  0xfd   :  { %881 = vmatpush1.bf16.msra.mxu0 %v1738_v55  ;;  %v974_v55 = vld [vmem:[#allocation10] sm:$0x3] }
  0xfe   :  { %893 = vmatprep.subr.bf16.mxu0 %v1749_v56  ;;  %v979_v56 = vrot.slane %v974_v55, %v227_v17  ;;  %v983_v57 = vrot.slane %v974_v55, %v231_v19 }
  0xff   :  { %1175 = vmatpush1.bf16.msra.mxu1 %v1800_v7 }
 0x100   :  { %883 = vmatmul.mubr.bf16.vlgmr.msra.gmra.mrb[0].mxu0 %v1742_v58  ;;  %1176 = vmatprep.subr.bf16.mxu1 %v1805_v8 }
 0x101   :  { %894 = vmatpush1.bf16.msra.mxu0 %v1747_v60  ;;  %925 = vmatprep.mubr.bf16.mxu0 %v2021_v63 }
 0x103   :  { %1177 = vmatpush1.bf16.msra.mxu1 %v1803_v9  ;;  %v1531_v9 = vld [vmem:[#allocation13] ss:$0 sm:$0xff] }
 0x104   :  { %1548 = vmatprep.subr.bf16.mxu1 %v1806_v10 }
 0x10c   :  { %1498 = vmatmul.mubr.msk.bf16.vlgmr.msra.gmra.mrb[0].mxu0 %vm760_vm0, %v1757_v3 }
 0x199   :  { %v798_v11 = vpop.f32.mrb[0].mxu1 }
 0x19a   :  { %v800_v12 = vpop.f32.mrb[1].mxu1  ;;  %v799_v22 = vadd.f32 %v798_v11, %v228_v20 }
 0x19b   :  { %v802_v13 = vpop.f32.mrb[2].mxu1  ;;  %v801_v23 = vadd.f32 %v800_v12, %v232_v21 }
 0x19c   :  { %v804_v14 = vpop.f32.mrb[3].mxu1  ;;  %v803_v25 = vadd.f32 %v802_v13, %v228_v20 }
 0x19d   :  { %v805_v28 = vadd.f32 %v804_v14, %v232_v21 }
 0x1df   :  { %v927_v24 = vpop.f32.mrb[0].mxu0 }
 0x1e0   :  { %v1571_v26 = vadd.f32 %v927_v24, %v799_v22  ;;  %v929_v27 = vpop.f32.mrb[1].mxu0 }
 0x1e1   :  { %v1573_v29 = vadd.f32 %v929_v27, %v801_v23  ;;  %v931_v30 = vpop.f32.mrb[2].mxu0 }
 0x1e2   :  { %v1575_v31 = vadd.f32 %v931_v30, %v803_v25  ;;  %v933_v32 = vpop.f32.mrb[3].mxu0  ;;  %v936_v34 = vmax.f32 %v1571_v26, 0.0 }
 0x1e3   :  { %v1577_v33 = vadd.f32 %v933_v32, %v805_v28  ;;  %v937_v36 = vmax.f32 %v1573_v29, 0.0 }
 0x1e4   :  { %v938_v35 = vmax.f32 %v1575_v31, 0.0 }
 0x1e5   :  { %v939_v37 = vmax.f32 %v1577_v33, 0.0 }
 0x1e6   :  { %v940_v38 = vpack.c.bf16 %v938_v35, %v936_v34 }
 0x1e7   :  { %v941_v39 = vpack.c.bf16 %v939_v37, %v937_v36 }
 0x1e9   :  { %1178 = vmatprep.mubr.bf16.mxu1 %v941_v39 }
 0x1ea   :  { %1179 = vmatmul.mubr.bf16.vlgmr.msra.gmra.mrb[4].mxu1 %v940_v38 }
 0x1eb   :  { %1549 = vmatpush3.bf16.msra.mxu1 %v1807_v40 }
 0x1ec   :  { %1550 = vmatprep.subr.bf16.mxu1 %v1808_v41 }
 0x1ef   :  { %1551 = vmatpush3.bf16.msra.mxu1 %v1809_v42 }
 0x1f0   :  { %1552 = vmatprep.subr.bf16.mxu1 %v1810_v43 }
 0x1f3   :  { %1553 = vmatpush3.bf16.msra.mxu1 %v1811_v44 }
 0x1f4   :  { %1554 = vmatprep.subr.bf16.mxu1 %v1812_v45 }
 0x1f7   :  { %1555 = vmatpush3.bf16.msra.mxu1 %v1813_v46 }
 0x1f8   :  { %1556 = vmatprep.subr.bf16.mxu1 %v1814_v47 }
 0x1fb   :  { %1557 = vmatpush3.bf16.msra.mxu1 %v1815_v48 }
 0x1fc   :  { %1558 = vmatprep.subr.bf16.mxu1 %v1816_v49 }
 0x1ff   :  { %1559 = vmatpush3.bf16.msra.mxu1 %v1817_v50 }
 0x200   :  { %1560 = vmatprep.subr.bf16.mxu1 %v1818_v51 }
 0x203   :  { %1561 = vmatpush3.bf16.msra.mxu1 %v1819_v52 }
 0x204   :  { %1562 = vmatprep.subr.bf16.mxu1 %v1820_v53 }
 0x207   :  { %1563 = vmatpush3.bf16.msra.mxu1 %v1821_v54 }
 0x2bd   :  { %v1180_v58 = vpop.f32.mrb[4].mxu1 }
 0x2be   :  { %v1181_v59 = vadd.f32 %v1180_v58, %v979_v56  ;;  %v1182_v60 = vpop.f32.mrb[5].mxu1 }
 0x2bf   :  { %v1183_v61 = vadd.f32 %v1182_v60, %v983_v57  ;;  %v1184_v62 = vpop.f32.mrb[6].mxu1 }
 0x2c0   :  { %v1185_v63 = vadd.f32 %v1184_v62, %v979_v56  ;;  %v1186_v0 = vpop.f32.mrb[7].mxu1  ;;  %v1189_v2 = vmax.f32 %v1181_v59, 0.0 }
 0x2c1   :  { %v1187_v1 = vadd.f32 %v1186_v0, %v983_v57  ;;  %v1190_v4 = vmax.f32 %v1183_v61, 0.0 }
 0x2c2   :  { %v1191_v3 = vmax.f32 %v1185_v63, 0.0 }
 0x2c3   :  { %v1192_v5 = vmax.f32 %v1187_v1, 0.0 }
 0x2c4   :  { %v1193_v6 = vpack.c.bf16 %v1191_v3, %v1189_v2 }
 0x2c5   :  { %v1194_v7 = vpack.c.bf16 %v1192_v5, %v1190_v4 }
 0x2c7   :  { %1362 = vmatprep.mubr.bf16.mxu1 %v1194_v7 }
 0x2c8   :  { %1363 = vmatmul.mubr.bf16.vlgmr.msra.gmra.mrb[8].mxu1 %v1193_v6 }
 0x39b   :  { %v1564_v8 = vpop.f32.mrb[8].mxu1 }
 0x39c   :  { %v1565_v10 = vpop.f32.mrb[9].mxu1 }
 0x39d   :  { %v1566_v11 = vadd.f32 %v1565_v10, %v1564_v8  ;;  %v1567_v12 = vpop.f32.mrb[10].mxu1 }
 0x39e   :  { %v1568_v13 = vpop.f32.mrb[11].mxu1 }
 0x39f   :  { %v1365_v14 = vadd.f32 %v1566_v11, %v1531_v9  ;;  %v1569_v15 = vadd.f32 %v1568_v13, %v1567_v12 }
 0x3a1   :  { %1371 = vst [vmem:[#allocation14] sm:$0xff] %v1365_v14  ;;  %v1368_v16 = vadd.f32 %v1569_v15, %v1531_v9 }
 0x3a3   :  { %1372 = vst [vmem:[#allocation14 + $0x8] sm:$0xff] %v1368_v16 }
 0x3a4   :  { %1987 = shalt.err (!%p1984_p4)
}
 0x3a5   :  { %s1988_s22 = scalar_lea.hbm %s2175_s7, 256 }
 0x3a6   :  { %p1989_p5 = scmp.ne.s32.totalorder %s2175_s7, %s1988_s22  ;;  %p1992_p6 = scmp.lt.u32.totalorder %s1988_s22, %s2175_s7 }
 0x3a8   :  { %p1994_p7 = pnand %p1992_p6, %p1989_p5 }
 0x3aa   :  { %1997 = shalt.err (!%p1994_p7)
}
 0x3ab   :  { %1384 = dma.vmem_to_hbm [thread:$0]  %s1379_s19, 256, %s2175_s7, [#allocation4], %s2009_s11, %s2009_s11, %s2010_s12  }
 0x3ac   :  { %2006 = dma.done.wait [#allocation4], 256  }
 0x3ad   :  { %2007 = vsyncadd [#allocation4], 4294967040 }
 0x3ae   :  { %1388 = vsyncpa [#allocation3], 1 }
 0x3af   :  { %1389 = vsyncpa [#allocation6], 1 }
 0x3b0   :  { %1390 = vsyncpa [#allocation9], 1 }
 0x3b1   :  { %1391 = vsyncpa [#allocation12], 1 }
 0x3b2   :  { %1392 = vsyncpa [#allocation4], 1 }

</bundles_post_ra>
